<compile_context>
chip_gen: v6e
topology: v6e:2x2x1
jax: 0.10.0
libtpu: 0.0.40
codegen_flags: <defaults>
</compile_context>

<pallas_src>
import functools

import jax
import jax.numpy as jnp
from jax.experimental import pallas as pl
from jax.experimental.pallas import tpu as pltpu

LANES = 128
SUBLANES = 8
MAX_TILE_ROWS = 2048          # (2048, 128) f32 block = 1 MiB per input per buffer
NUM_SPLITS = 2                # shard reduction across TensorCores (v7x); no-op on 1-TC chips
EPS = 1e-9


def _bce_dice_kernel(x_ref, t_ref, acc_ref, *, tile_rows, tiles_per_split,
                     first_masked_tile, n_valid):
    # x_ref, t_ref: VMEM (tile_rows, 128) logits / targets tiles (original dtype).
    # acc_ref:      VMEM (4, 8, 128) f32 resident output block (per split):
    #               [sum_bce, sum_p*t, sum_p, sum_t] as vector partials.
    i = pl.program_id(0)                 # split (TensorCore) index
    j = pl.program_id(1)                 # tile index within split
    g = i * tiles_per_split + j          # global (unclamped) row-tile index

    @pl.when(j == 0)
    def _init():
        acc_ref[...] = jnp.zeros_like(acc_ref)

    def _fold(v):
        # (tile_rows, 128) -> (8, 128): pure vreg adds on the VPU.
        return jnp.sum(v.reshape(-1, SUBLANES, LANES), axis=0)

    def _accumulate(masked):
        x = x_ref[...].astype(jnp.float32)
        t = t_ref[...].astype(jnp.float32)
        # Share exp(-|x|) between sigmoid (dice) and stable BCE-with-logits.
        e = jnp.exp(-jnp.abs(x))
        r = 1.0 / (1.0 + e)                        # sigmoid(|x|)
        p = jnp.where(x >= 0.0, r, 1.0 - r)        # sigmoid(x)
        bce = jnp.maximum(x, 0.0) - x * t + jnp.log(1.0 + e)
        pt = p * t
        if masked:
            row0 = g * tile_rows
            ridx = jax.lax.broadcasted_iota(jnp.int32, x.shape, 0) + row0
            cidx = jax.lax.broadcasted_iota(jnp.int32, x.shape, 1)
            valid = ridx * LANES + cidx < n_valid
            bce = jnp.where(valid, bce, 0.0)
            pt = jnp.where(valid, pt, 0.0)
            p = jnp.where(valid, p, 0.0)
            t = jnp.where(valid, t, 0.0)
        acc_ref[0] += _fold(bce)
        acc_ref[1] += _fold(pt)
        acc_ref[2] += _fold(p)
        acc_ref[3] += _fold(t)

    @pl.when(g < first_masked_tile)      # fully-valid tiles: no mask overhead
    def _full_tile():
        _accumulate(masked=False)

    @pl.when(g >= first_masked_tile)     # tail / overhang tiles: mask invalid lanes
    def _tail_tile():
        _accumulate(masked=True)


@jax.jit
def bce_dice_loss(logits, targets):
    assert logits.shape == targets.shape
    n = logits.size                      # static under jit
    x = logits.reshape(-1)
    t = targets.reshape(-1)

    chunk = SUBLANES * LANES             # 1024
    rem = n % chunk
    if rem:
        # Only pad the sub-(8*128) remainder (<= 1023 elements); the common
        # segmentation-shaped inputs skip this copy entirely.
        pad = chunk - rem
        x = jnp.pad(x, (0, pad))
        t = jnp.pad(t, (0, pad))
    rows = x.size // LANES               # multiple of 8
    x2 = x.reshape(rows, LANES)
    t2 = t.reshape(rows, LANES)

    tile_rows = min(MAX_TILE_ROWS, rows)
    num_tiles = pl.cdiv(rows, tile_rows)
    tiles_per_split = pl.cdiv(num_tiles, NUM_SPLITS)
    first_masked_tile = n // (tile_rows * LANES)

    kernel = functools.partial(
        _bce_dice_kernel,
        tile_rows=tile_rows,
        tiles_per_split=tiles_per_split,
        first_masked_tile=first_masked_tile,
        n_valid=n,
    )

    def in_map(i, j):
        # Clamp so overhang iterations (beyond the last real tile) never DMA
        # out of bounds; their contribution is fully masked in the kernel.
        return (jnp.minimum(i * tiles_per_split + j, num_tiles - 1), 0)

    partials = pl.pallas_call(
        kernel,
        out_shape=jax.ShapeDtypeStruct((NUM_SPLITS, 4, SUBLANES, LANES),
                                       jnp.float32),
        grid_spec=pltpu.PrefetchScalarGridSpec(
            num_scalar_prefetch=0,
            grid=(NUM_SPLITS, tiles_per_split),
            in_specs=[
                pl.BlockSpec((tile_rows, LANES), in_map),
                pl.BlockSpec((tile_rows, LANES), in_map),
            ],
            out_specs=pl.BlockSpec((None, 4, SUBLANES, LANES),
                                   lambda i, j: (i, 0, 0, 0)),
        ),
        compiler_params=pltpu.CompilerParams(
            dimension_semantics=("parallel", "arbitrary"),
            vmem_limit_bytes=32 * 1024 * 1024,
        ),
    )(x2, t2)

    sums = jnp.sum(partials, axis=(0, 2, 3))         # (4,) tiny final reduce
    sum_bce, sum_pt, sum_p, sum_t = sums[0], sums[1], sums[2], sums[3]
    bce_loss = sum_bce / jnp.float32(n)
    dice_score = (2.0 * sum_pt + EPS) / (sum_p + sum_t)
    return bce_loss + (1.0 - dice_score)


def _reference(logits, targets):
    # Faithful to nn.BCEWithLogitsLoss() + DiceLoss(eps=1e-9).
    x = logits.astype(jnp.float32)
    t = targets.astype(jnp.float32)
    bce = jnp.mean(jnp.maximum(x, 0.0) - x * t + jnp.log1p(jnp.exp(-jnp.abs(x))))
    p = jax.nn.sigmoid(x)
    intersection = 2.0 * jnp.sum(p * t)
    union = jnp.sum(p) + jnp.sum(t)
    dice_score = (intersection + EPS) / union
    return bce + (1.0 - dice_score)


if __name__ == "__main__":
    key = jax.random.PRNGKey(0)
    k1, k2 = jax.random.split(key)
    # NCHW, matching the PyTorch module's segmentation-style input.
    logits = jax.random.normal(k1, (2, 4, 16, 16), dtype=jnp.float32)
    targets = (jax.random.uniform(k2, (2, 4, 16, 16)) > 0.5).astype(jnp.float32)

    loss = bce_dice_loss(logits, targets)
    jax.block_until_ready(loss)

    ref = _reference(logits, targets)
    assert jnp.allclose(loss, ref, rtol=1e-5, atol=1e-5), (loss, ref)
    print("KERNEL_OK")
</pallas_src>

<mosaic_0001>
module attributes {stable_mosaic.version = 11 : i64} {
  func.func @_bce_dice_kernel(%arg0: i32, %arg1: i32, %arg2: memref<16x128xf32, #tpu.memory_space<vmem>>, %arg3: memref<16x128xf32, #tpu.memory_space<vmem>>, %arg4: memref<1x4x8x128xf32, #tpu.memory_space<vmem>>) attributes {dimension_semantics = [#tpu.dimension_semantics<parallel>, #tpu.dimension_semantics<arbitrary>], iteration_bounds = array<i64: 2, 1>, scalar_prefetch = 0 : i64, scratch_operands = 0 : i64, tpu.core_type = #tpu.core_type<tc>, window_params = [{transform_indices = @transform_0, window_bounds = array<i64: 16, 128>}, {transform_indices = @transform_1, window_bounds = array<i64: 16, 128>}, {transform_indices = @transform_2, window_bounds = array<i64: 1, 4, 8, 128>}]} {
    %c1_i32 = arith.constant 1 : i32
    %0 = arith.muli %arg0, %c1_i32 : i32
    %1 = arith.addi %0, %arg1 : i32
    %c0_i32 = arith.constant 0 : i32
    %2 = arith.cmpi eq, %arg1, %c0_i32 : i32
    %3 = arith.extui %2 : i1 to i32
    %c0_i32_0 = arith.constant 0 : i32
    %4 = arith.cmpi ne, %3, %c0_i32_0 : i32
    scf.if %4 {
      %cst = arith.constant 0.000000e+00 : f32
      %11 = vector.broadcast %cst : f32 to vector<4x8x128xf32>
      %c0 = arith.constant 0 : index
      %c0_5 = arith.constant 0 : index
      %c0_6 = arith.constant 0 : index
      %c0_7 = arith.constant 0 : index
      %12 = vector.load %arg4[%c0, %c0_5, %c0_6, %c0_7] : memref<1x4x8x128xf32, #tpu.memory_space<vmem>>, vector<1x4x8x128xf32>
      %13 = vector.shape_cast %12 : vector<1x4x8x128xf32> to vector<4x8x128xf32>
      %14 = vector.shape_cast %11 : vector<4x8x128xf32> to vector<1x4x8x128xf32>
      tpu.vector_store %arg4[%c0, %c0_5, %c0_6, %c0_7], %14 {strides = array<i32>} : memref<1x4x8x128xf32, #tpu.memory_space<vmem>>, vector<1x4x8x128xf32>,
    } else {
    }
    %c1_i32_1 = arith.constant 1 : i32
    %5 = arith.cmpi slt, %1, %c1_i32_1 : i32
    %6 = arith.extui %5 : i1 to i32
    %c0_i32_2 = arith.constant 0 : i32
    %7 = arith.cmpi ne, %6, %c0_i32_2 : i32
    scf.if %7 {
      %c0 = arith.constant 0 : index
      %c0_5 = arith.constant 0 : index
      %11 = vector.load %arg2[%c0, %c0_5] : memref<16x128xf32, #tpu.memory_space<vmem>>, vector<16x128xf32>
      %c0_6 = arith.constant 0 : index
      %c0_7 = arith.constant 0 : index
      %12 = vector.load %arg3[%c0_6, %c0_7] : memref<16x128xf32, #tpu.memory_space<vmem>>, vector<16x128xf32>
      %13 = math.absf %11 : vector<16x128xf32>
      %cst = arith.constant 0.000000e+00 : f32
      %14 = vector.broadcast %cst : f32 to vector<16x128xf32>
      %15 = arith.subf %14, %13 : vector<16x128xf32>
      %16 = math.exp %15 : vector<16x128xf32>
      %cst_8 = arith.constant 1.000000e+00 : f32
      %17 = vector.broadcast %cst_8 : f32 to vector<16x128xf32>
      %18 = arith.addf %17, %16 : vector<16x128xf32>
      %cst_9 = arith.constant 1.000000e+00 : f32
      %19 = vector.broadcast %cst_9 : f32 to vector<16x128xf32>
      %20 = arith.divf %19, %18 : vector<16x128xf32>
      %cst_10 = arith.constant 0.000000e+00 : f32
      %21 = vector.broadcast %cst_10 : f32 to vector<16x128xf32>
      %22 = arith.cmpf oge, %11, %21 : vector<16x128xf32>
      %cst_11 = arith.constant 1.000000e+00 : f32
      %23 = vector.broadcast %cst_11 : f32 to vector<16x128xf32>
      %24 = arith.subf %23, %20 : vector<16x128xf32>
      %25 = arith.select %22, %20, %24 : vector<16x128xi1>, vector<16x128xf32>
      %cst_12 = arith.constant 0.000000e+00 : f32
      %26 = vector.broadcast %cst_12 : f32 to vector<16x128xf32>
      %27 = arith.maximumf %11, %26 : vector<16x128xf32>
      %28 = arith.mulf %11, %12 : vector<16x128xf32>
      %29 = arith.subf %27, %28 : vector<16x128xf32>
      %cst_13 = arith.constant 1.000000e+00 : f32
      %30 = vector.broadcast %cst_13 : f32 to vector<16x128xf32>
      %31 = arith.addf %30, %16 : vector<16x128xf32>
      %32 = math.log %31 : vector<16x128xf32>
      %33 = arith.addf %29, %32 : vector<16x128xf32>
      %34 = arith.mulf %25, %12 : vector<16x128xf32>
      %c0_14 = arith.constant 0 : index
      %c0_15 = arith.constant 0 : index
      %c0_16 = arith.constant 0 : index
      %c0_17 = arith.constant 0 : index
      %35 = vector.load %arg4[%c0_14, %c0_15, %c0_16, %c0_17] : memref<1x4x8x128xf32, #tpu.memory_space<vmem>>, vector<1x1x8x128xf32>
      %36 = vector.shape_cast %35 : vector<1x1x8x128xf32> to vector<8x128xf32>
      %37 = vector.shape_cast %33 : vector<16x128xf32> to vector<2x8x128xf32>
      %cst_18 = arith.constant dense<0.000000e+00> : vector<8x128xf32>
      %38 = vector.multi_reduction <add>, %37, %cst_18 [0] : vector<2x8x128xf32> to vector<8x128xf32>
      %39 = arith.addf %36, %38 : vector<8x128xf32>
      %c0_19 = arith.constant 0 : index
      %c0_20 = arith.constant 0 : index
      %c0_21 = arith.constant 0 : index
      %c0_22 = arith.constant 0 : index
      %40 = vector.load %arg4[%c0_19, %c0_20, %c0_21, %c0_22] : memref<1x4x8x128xf32, #tpu.memory_space<vmem>>, vector<1x1x8x128xf32>
      %41 = vector.shape_cast %40 : vector<1x1x8x128xf32> to vector<8x128xf32>
      %42 = vector.shape_cast %39 : vector<8x128xf32> to vector<1x1x8x128xf32>
      tpu.vector_store %arg4[%c0_19, %c0_20, %c0_21, %c0_22], %42 {strides = array<i32>} : memref<1x4x8x128xf32, #tpu.memory_space<vmem>>, vector<1x1x8x128xf32>,
      %c0_23 = arith.constant 0 : index
      %c1 = arith.constant 1 : index
      %c0_24 = arith.constant 0 : index
      %c0_25 = arith.constant 0 : index
      %43 = vector.load %arg4[%c0_23, %c1, %c0_24, %c0_25] : memref<1x4x8x128xf32, #tpu.memory_space<vmem>>, vector<1x1x8x128xf32>
      %44 = vector.shape_cast %43 : vector<1x1x8x128xf32> to vector<8x128xf32>
      %45 = vector.shape_cast %34 : vector<16x128xf32> to vector<2x8x128xf32>
      %cst_26 = arith.constant dense<0.000000e+00> : vector<8x128xf32>
      %46 = vector.multi_reduction <add>, %45, %cst_26 [0] : vector<2x8x128xf32> to vector<8x128xf32>
      %47 = arith.addf %44, %46 : vector<8x128xf32>
      %c0_27 = arith.constant 0 : index
      %c1_28 = arith.constant 1 : index
      %c0_29 = arith.constant 0 : index
      %c0_30 = arith.constant 0 : index
      %48 = vector.load %arg4[%c0_27, %c1_28, %c0_29, %c0_30] : memref<1x4x8x128xf32, #tpu.memory_space<vmem>>, vector<1x1x8x128xf32>
      %49 = vector.shape_cast %48 : vector<1x1x8x128xf32> to vector<8x128xf32>
      %50 = vector.shape_cast %47 : vector<8x128xf32> to vector<1x1x8x128xf32>
      tpu.vector_store %arg4[%c0_27, %c1_28, %c0_29, %c0_30], %50 {strides = array<i32>} : memref<1x4x8x128xf32, #tpu.memory_space<vmem>>, vector<1x1x8x128xf32>,
      %c0_31 = arith.constant 0 : index
      %c2 = arith.constant 2 : index
      %c0_32 = arith.constant 0 : index
      %c0_33 = arith.constant 0 : index
      %51 = vector.load %arg4[%c0_31, %c2, %c0_32, %c0_33] : memref<1x4x8x128xf32, #tpu.memory_space<vmem>>, vector<1x1x8x128xf32>
      %52 = vector.shape_cast %51 : vector<1x1x8x128xf32> to vector<8x128xf32>
      %53 = vector.shape_cast %25 : vector<16x128xf32> to vector<2x8x128xf32>
      %cst_34 = arith.constant dense<0.000000e+00> : vector<8x128xf32>
      %54 = vector.multi_reduction <add>, %53, %cst_34 [0] : vector<2x8x128xf32> to vector<8x128xf32>
      %55 = arith.addf %52, %54 : vector<8x128xf32>
      %c0_35 = arith.constant 0 : index
      %c2_36 = arith.constant 2 : index
      %c0_37 = arith.constant 0 : index
      %c0_38 = arith.constant 0 : index
      %56 = vector.load %arg4[%c0_35, %c2_36, %c0_37, %c0_38] : memref<1x4x8x128xf32, #tpu.memory_space<vmem>>, vector<1x1x8x128xf32>
      %57 = vector.shape_cast %56 : vector<1x1x8x128xf32> to vector<8x128xf32>
      %58 = vector.shape_cast %55 : vector<8x128xf32> to vector<1x1x8x128xf32>
      tpu.vector_store %arg4[%c0_35, %c2_36, %c0_37, %c0_38], %58 {strides = array<i32>} : memref<1x4x8x128xf32, #tpu.memory_space<vmem>>, vector<1x1x8x128xf32>,
      %c0_39 = arith.constant 0 : index
      %c3 = arith.constant 3 : index
      %c0_40 = arith.constant 0 : index
      %c0_41 = arith.constant 0 : index
      %59 = vector.load %arg4[%c0_39, %c3, %c0_40, %c0_41] : memref<1x4x8x128xf32, #tpu.memory_space<vmem>>, vector<1x1x8x128xf32>
      %60 = vector.shape_cast %59 : vector<1x1x8x128xf32> to vector<8x128xf32>
      %61 = vector.shape_cast %12 : vector<16x128xf32> to vector<2x8x128xf32>
      %cst_42 = arith.constant dense<0.000000e+00> : vector<8x128xf32>
      %62 = vector.multi_reduction <add>, %61, %cst_42 [0] : vector<2x8x128xf32> to vector<8x128xf32>
      %63 = arith.addf %60, %62 : vector<8x128xf32>
      %c0_43 = arith.constant 0 : index
      %c3_44 = arith.constant 3 : index
      %c0_45 = arith.constant 0 : index
      %c0_46 = arith.constant 0 : index
      %64 = vector.load %arg4[%c0_43, %c3_44, %c0_45, %c0_46] : memref<1x4x8x128xf32, #tpu.memory_space<vmem>>, vector<1x1x8x128xf32>
      %65 = vector.shape_cast %64 : vector<1x1x8x128xf32> to vector<8x128xf32>
      %66 = vector.shape_cast %63 : vector<8x128xf32> to vector<1x1x8x128xf32>
      tpu.vector_store %arg4[%c0_43, %c3_44, %c0_45, %c0_46], %66 {strides = array<i32>} : memref<1x4x8x128xf32, #tpu.memory_space<vmem>>, vector<1x1x8x128xf32>,
    } else {
    }
    %c1_i32_3 = arith.constant 1 : i32
    %8 = arith.cmpi sge, %1, %c1_i32_3 : i32
    %9 = arith.extui %8 : i1 to i32
    %c0_i32_4 = arith.constant 0 : i32
    %10 = arith.cmpi ne, %9, %c0_i32_4 : i32
    scf.if %10 {
      %c0 = arith.constant 0 : index
      %c0_5 = arith.constant 0 : index
      %11 = vector.load %arg2[%c0, %c0_5] : memref<16x128xf32, #tpu.memory_space<vmem>>, vector<16x128xf32>
      %c0_6 = arith.constant 0 : index
      %c0_7 = arith.constant 0 : index
      %12 = vector.load %arg3[%c0_6, %c0_7] : memref<16x128xf32, #tpu.memory_space<vmem>>, vector<16x128xf32>
      %13 = math.absf %11 : vector<16x128xf32>
      %cst = arith.constant 0.000000e+00 : f32
      %14 = vector.broadcast %cst : f32 to vector<16x128xf32>
      %15 = arith.subf %14, %13 : vector<16x128xf32>
      %16 = math.exp %15 : vector<16x128xf32>
      %cst_8 = arith.constant 1.000000e+00 : f32
      %17 = vector.broadcast %cst_8 : f32 to vector<16x128xf32>
      %18 = arith.addf %17, %16 : vector<16x128xf32>
      %cst_9 = arith.constant 1.000000e+00 : f32
      %19 = vector.broadcast %cst_9 : f32 to vector<16x128xf32>
      %20 = arith.divf %19, %18 : vector<16x128xf32>
      %cst_10 = arith.constant 0.000000e+00 : f32
      %21 = vector.broadcast %cst_10 : f32 to vector<16x128xf32>
      %22 = arith.cmpf oge, %11, %21 : vector<16x128xf32>
      %cst_11 = arith.constant 1.000000e+00 : f32
      %23 = vector.broadcast %cst_11 : f32 to vector<16x128xf32>
      %24 = arith.subf %23, %20 : vector<16x128xf32>
      %25 = arith.select %22, %20, %24 : vector<16x128xi1>, vector<16x128xf32>
      %cst_12 = arith.constant 0.000000e+00 : f32
      %26 = vector.broadcast %cst_12 : f32 to vector<16x128xf32>
      %27 = arith.maximumf %11, %26 : vector<16x128xf32>
      %28 = arith.mulf %11, %12 : vector<16x128xf32>
      %29 = arith.subf %27, %28 : vector<16x128xf32>
      %cst_13 = arith.constant 1.000000e+00 : f32
      %30 = vector.broadcast %cst_13 : f32 to vector<16x128xf32>
      %31 = arith.addf %30, %16 : vector<16x128xf32>
      %32 = math.log %31 : vector<16x128xf32>
      %33 = arith.addf %29, %32 : vector<16x128xf32>
      %34 = arith.mulf %25, %12 : vector<16x128xf32>
      %c16_i32 = arith.constant 16 : i32
      %35 = arith.muli %1, %c16_i32 : i32
      %36 = tpu.iota {dimensions = array<i32: 0>} : vector<16x128xi32>
      %37 = vector.broadcast %35 : i32 to vector<16x128xi32>
      %38 = arith.addi %36, %37 : vector<16x128xi32>
      %39 = tpu.iota {dimensions = array<i32: 1>} : vector<16x128xi32>
      %c128_i32 = arith.constant 128 : i32
      %40 = vector.broadcast %c128_i32 : i32 to vector<16x128xi32>
      %41 = arith.muli %38, %40 : vector<16x128xi32>
      %42 = arith.addi %41, %39 : vector<16x128xi32>
      %c2048_i32 = arith.constant 2048 : i32
      %43 = vector.broadcast %c2048_i32 : i32 to vector<16x128xi32>
      %44 = arith.cmpi slt, %42, %43 : vector<16x128xi32>
      %cst_14 = arith.constant 0.000000e+00 : f32
      %45 = vector.broadcast %cst_14 : f32 to vector<16x128xf32>
      %46 = arith.select %44, %33, %45 : vector<16x128xi1>, vector<16x128xf32>
      %cst_15 = arith.constant 0.000000e+00 : f32
      %47 = vector.broadcast %cst_15 : f32 to vector<16x128xf32>
      %48 = arith.select %44, %34, %47 : vector<16x128xi1>, vector<16x128xf32>
      %cst_16 = arith.constant 0.000000e+00 : f32
      %49 = vector.broadcast %cst_16 : f32 to vector<16x128xf32>
      %50 = arith.select %44, %25, %49 : vector<16x128xi1>, vector<16x128xf32>
      %cst_17 = arith.constant 0.000000e+00 : f32
      %51 = vector.broadcast %cst_17 : f32 to vector<16x128xf32>
      %52 = arith.select %44, %12, %51 : vector<16x128xi1>, vector<16x128xf32>
      %c0_18 = arith.constant 0 : index
      %c0_19 = arith.constant 0 : index
      %c0_20 = arith.constant 0 : index
      %c0_21 = arith.constant 0 : index
      %53 = vector.load %arg4[%c0_18, %c0_19, %c0_20, %c0_21] : memref<1x4x8x128xf32, #tpu.memory_space<vmem>>, vector<1x1x8x128xf32>
      %54 = vector.shape_cast %53 : vector<1x1x8x128xf32> to vector<8x128xf32>
      %55 = vector.shape_cast %46 : vector<16x128xf32> to vector<2x8x128xf32>
      %cst_22 = arith.constant dense<0.000000e+00> : vector<8x128xf32>
      %56 = vector.multi_reduction <add>, %55, %cst_22 [0] : vector<2x8x128xf32> to vector<8x128xf32>
      %57 = arith.addf %54, %56 : vector<8x128xf32>
      %c0_23 = arith.constant 0 : index
      %c0_24 = arith.constant 0 : index
      %c0_25 = arith.constant 0 : index
      %c0_26 = arith.constant 0 : index
      %58 = vector.load %arg4[%c0_23, %c0_24, %c0_25, %c0_26] : memref<1x4x8x128xf32, #tpu.memory_space<vmem>>, vector<1x1x8x128xf32>
      %59 = vector.shape_cast %58 : vector<1x1x8x128xf32> to vector<8x128xf32>
      %60 = vector.shape_cast %57 : vector<8x128xf32> to vector<1x1x8x128xf32>
      tpu.vector_store %arg4[%c0_23, %c0_24, %c0_25, %c0_26], %60 {strides = array<i32>} : memref<1x4x8x128xf32, #tpu.memory_space<vmem>>, vector<1x1x8x128xf32>,
      %c0_27 = arith.constant 0 : index
      %c1 = arith.constant 1 : index
      %c0_28 = arith.constant 0 : index
      %c0_29 = arith.constant 0 : index
      %61 = vector.load %arg4[%c0_27, %c1, %c0_28, %c0_29] : memref<1x4x8x128xf32, #tpu.memory_space<vmem>>, vector<1x1x8x128xf32>
      %62 = vector.shape_cast %61 : vector<1x1x8x128xf32> to vector<8x128xf32>
      %63 = vector.shape_cast %48 : vector<16x128xf32> to vector<2x8x128xf32>
      %cst_30 = arith.constant dense<0.000000e+00> : vector<8x128xf32>
      %64 = vector.multi_reduction <add>, %63, %cst_30 [0] : vector<2x8x128xf32> to vector<8x128xf32>
      %65 = arith.addf %62, %64 : vector<8x128xf32>
      %c0_31 = arith.constant 0 : index
      %c1_32 = arith.constant 1 : index
      %c0_33 = arith.constant 0 : index
      %c0_34 = arith.constant 0 : index
      %66 = vector.load %arg4[%c0_31, %c1_32, %c0_33, %c0_34] : memref<1x4x8x128xf32, #tpu.memory_space<vmem>>, vector<1x1x8x128xf32>
      %67 = vector.shape_cast %66 : vector<1x1x8x128xf32> to vector<8x128xf32>
      %68 = vector.shape_cast %65 : vector<8x128xf32> to vector<1x1x8x128xf32>
      tpu.vector_store %arg4[%c0_31, %c1_32, %c0_33, %c0_34], %68 {strides = array<i32>} : memref<1x4x8x128xf32, #tpu.memory_space<vmem>>, vector<1x1x8x128xf32>,
      %c0_35 = arith.constant 0 : index
      %c2 = arith.constant 2 : index
      %c0_36 = arith.constant 0 : index
      %c0_37 = arith.constant 0 : index
      %69 = vector.load %arg4[%c0_35, %c2, %c0_36, %c0_37] : memref<1x4x8x128xf32, #tpu.memory_space<vmem>>, vector<1x1x8x128xf32>
      %70 = vector.shape_cast %69 : vector<1x1x8x128xf32> to vector<8x128xf32>
      %71 = vector.shape_cast %50 : vector<16x128xf32> to vector<2x8x128xf32>
      %cst_38 = arith.constant dense<0.000000e+00> : vector<8x128xf32>
      %72 = vector.multi_reduction <add>, %71, %cst_38 [0] : vector<2x8x128xf32> to vector<8x128xf32>
      %73 = arith.addf %70, %72 : vector<8x128xf32>
      %c0_39 = arith.constant 0 : index
      %c2_40 = arith.constant 2 : index
      %c0_41 = arith.constant 0 : index
      %c0_42 = arith.constant 0 : index
      %74 = vector.load %arg4[%c0_39, %c2_40, %c0_41, %c0_42] : memref<1x4x8x128xf32, #tpu.memory_space<vmem>>, vector<1x1x8x128xf32>
      %75 = vector.shape_cast %74 : vector<1x1x8x128xf32> to vector<8x128xf32>
      %76 = vector.shape_cast %73 : vector<8x128xf32> to vector<1x1x8x128xf32>
      tpu.vector_store %arg4[%c0_39, %c2_40, %c0_41, %c0_42], %76 {strides = array<i32>} : memref<1x4x8x128xf32, #tpu.memory_space<vmem>>, vector<1x1x8x128xf32>,
      %c0_43 = arith.constant 0 : index
      %c3 = arith.constant 3 : index
      %c0_44 = arith.constant 0 : index
      %c0_45 = arith.constant 0 : index
      %77 = vector.load %arg4[%c0_43, %c3, %c0_44, %c0_45] : memref<1x4x8x128xf32, #tpu.memory_space<vmem>>, vector<1x1x8x128xf32>
      %78 = vector.shape_cast %77 : vector<1x1x8x128xf32> to vector<8x128xf32>
      %79 = vector.shape_cast %52 : vector<16x128xf32> to vector<2x8x128xf32>
      %cst_46 = arith.constant dense<0.000000e+00> : vector<8x128xf32>
      %80 = vector.multi_reduction <add>, %79, %cst_46 [0] : vector<2x8x128xf32> to vector<8x128xf32>
      %81 = arith.addf %78, %80 : vector<8x128xf32>
      %c0_47 = arith.constant 0 : index
      %c3_48 = arith.constant 3 : index
      %c0_49 = arith.constant 0 : index
      %c0_50 = arith.constant 0 : index
      %82 = vector.load %arg4[%c0_47, %c3_48, %c0_49, %c0_50] : memref<1x4x8x128xf32, #tpu.memory_space<vmem>>, vector<1x1x8x128xf32>
      %83 = vector.shape_cast %82 : vector<1x1x8x128xf32> to vector<8x128xf32>
      %84 = vector.shape_cast %81 : vector<8x128xf32> to vector<1x1x8x128xf32>
      tpu.vector_store %arg4[%c0_47, %c3_48, %c0_49, %c0_50], %84 {strides = array<i32>} : memref<1x4x8x128xf32, #tpu.memory_space<vmem>>, vector<1x1x8x128xf32>,
    } else {
    }
    return
  }
  func.func @transform_0(%arg0: i32, %arg1: i32) -> (i32, i32) {
    %c1_i32 = arith.constant 1 : i32
    %0 = arith.muli %arg0, %c1_i32 : i32
    %1 = arith.addi %0, %arg1 : i32
    %c0_i32 = arith.constant 0 : i32
    %2 = arith.minsi %1, %c0_i32 : i32
    %c0_i32_0 = arith.constant 0 : i32
    %c0_i32_1 = arith.constant 0 : i32
    return %2, %c0_i32_0 : i32, i32
  }
  func.func @transform_1(%arg0: i32, %arg1: i32) -> (i32, i32) {
    %c1_i32 = arith.constant 1 : i32
    %0 = arith.muli %arg0, %c1_i32 : i32
    %1 = arith.addi %0, %arg1 : i32
    %c0_i32 = arith.constant 0 : i32
    %2 = arith.minsi %1, %c0_i32 : i32
    %c0_i32_0 = arith.constant 0 : i32
    %c0_i32_1 = arith.constant 0 : i32
    return %2, %c0_i32_0 : i32, i32
  }
  func.func @transform_2(%arg0: i32, %arg1: i32) -> (i32, i32, i32, i32) {
    %c0_i32 = arith.constant 0 : i32
    %c0_i32_0 = arith.constant 0 : i32
    %c0_i32_1 = arith.constant 0 : i32
    %c0_i32_2 = arith.constant 0 : i32
    return %arg0, %c0_i32, %c0_i32_0, %c0_i32_1 : i32, i32, i32, i32
  }
}

</mosaic_0001>

<bundles_post_ra>
// kernel: bce_dice_loss.1
= control target key start
LH: loop header
LB: loop body
LE: loop exit
PB: predicated region body
PF: predicated region fallthrough
CT: control target
= control target key end

     0   :  { %s569_s9 = smov 0   ;;  %s571_s10 = smov 0   ;;  %s659_s0 = inlined_call_operand.vmem [shape: f32[16,128], index: 0, kind: input, shape index: {}]   ;;  %s660_s1 = inlined_call_operand.vmem [shape: f32[16,128], index: 1, kind: input, shape index: {}]   ;;  %s661_s2 = inlined_call_operand.vmem [shape: f32[2,4,8,128], index: 2, kind: output, shape index: {}]  }
   0x1   :  { %s573_s11 = smov 0  }
   0x2 LB: > { %s24_s12 = sadd.s32 1, %s547_s10  ;;  %p455_p0 = scmp.ge.s32.totalorder %s551_s11, 1  ;;  %s551_s11 = sphi %s573_s11, %s12_s11   ;;  %s547_s10 = sphi %s571_s10, %s663_s10   ;;  %s543_s9 = sphi %s569_s9, %s662_s9  }
   0x3   : > { %p26_p1 = scmp.ge.s32.totalorder %s24_s12, 2  ;;  %p160_p2 = scmp.lt.s32.totalorder %s551_s11, 3 }
   0x5   : > { %s665_s12 = smov (%p26_p1, %s24_s12), 0  ;;  %p161_p3 = pnand %p455_p0, %p160_p2 }
   0x6   : > { %p194_p4 = scmp.lt.s32.totalorder (!%p161_p3), %s543_s9, 0  ;;  %p217_p5 = scmp.lt.s32.totalorder (!%p161_p3), %s543_s9, 1 }
   0x7   : > { %164 = sbr.rel (%p161_p3) target bundleno = 125 (0x7d), region = 28  ;;  %p462_p7 = scmp.ge.s32.totalorder (!%p161_p3), %s543_s9, 1 }
   0xc   : > { %s195_s13 = scalar_select %p194_p4, %s543_s9, 0  ;;  %v553_v0 = vmov 0.0  }
   0xd   : > { %s218_s14 = scalar_select %p217_p5, %s543_s9, 1 }
   0xe   : > { %s456_s15 = sshll.u32 %s195_s13, 1 }
   0xf   : > { %p197_p6 = scmp.lt.s32.totalorder %s456_s15, 1  ;;  %s479_s16 = sshll.u32 %s218_s14, 5 }
  0x10   : > { %s598_s19 = scalar_lea.vmem %s661_s2, %s479_s16  ;;  %234 = sbr.rel (%p462_p7) target bundleno = 70 (0x46), region = 36 }
  0x11   : > { %s667_s15 = smov (!%p197_p6, %s456_s15), 1  ;;  %227 = vst [vmem:[%s598_s19] sm:$0xff] %v553_v0  ;;  %228 = vst [vmem:[%s598_s19 + $0x8] sm:$0xff] %v553_v0 }
  0x12   : > { %229 = vst [vmem:[%s598_s19 + $0x10] sm:$0xff] %v553_v0  ;;  %230 = vst [vmem:[%s598_s19 + $0x18] sm:$0xff] %v553_v0  ;;  %s457_s20 = sshll.u32 %s667_s15, 3 }
  0x13   : > { %s607_s23 = scalar_lea.vmem %s659_s0, %s457_s20  ;;  %s612_s26 = scalar_lea.vmem %s660_s1, %s457_s20 }
  0x15   : > { %v235_v1 = vld [vmem:[%s607_s23] sm:$0xff]  ;;  %v236_v2 = vld [vmem:[%s607_s23 + $0x8] sm:$0xff] }
  0x16   : > { %v239_v3 = vand.u32 2147483647, %v235_v1  ;;  %v240_v4 = vand.u32 2147483647, %v236_v2  ;;  %v237_v5 = vld [vmem:[%s612_s26] sm:$0xff]  ;;  %v238_v6 = vld [vmem:[%s612_s26 + $0x8] sm:$0xff] }
  0x17   : > { %v289_v10 = vadd.f32 %v238_v6, %v237_v5  ;;  %v259_v18 = vmax.f32 %v235_v1, 0.0  ;;  %v261_v19 = vmul.f32 %v237_v5, %v235_v1  ;;  %v260_v20 = vmax.f32 %v236_v2, 0.0 }
  0x18   : > { %v241_v7 = vsub.f32 0.0, %v239_v3  ;;  %v242_v8 = vsub.f32 0.0, %v240_v4  ;;  %v262_v21 = vmul.f32 %v238_v6, %v236_v2  ;;  %vm253_vm0 = vcmp.ge.f32.partialorder %v235_v1, 0.0  ;;  %v463_v40 = vld [vmem:[%s598_s19 + $0x8] sm:$0xff]  ;;  %v273_v41 = vld [vmem:[%s598_s19] sm:$0xff] }
  0x19   : > { %v467_v9 = vld [vmem:[%s598_s19 + $0x18] sm:$0xff]  ;;  %v263_v24 = vsub.f32 %v259_v18, %v261_v19  ;;  %vm254_vm1 = vcmp.ge.f32.partialorder %v236_v2, 0.0  ;;  %v465_v35 = vld [vmem:[%s598_s19 + $0x10] sm:$0xff] }
  0x1a   : > { %v243_v11 = vmul.f32 1.442695, %v241_v7  ;;  %v245_v12 = vmul.f32 1.442695, %v242_v8  ;;  %v290_v13 = vadd.f32 %v467_v9, %v289_v10  ;;  %v264_v27 = vsub.f32 %v260_v20, %v262_v21 }
  0x1c   : > { %505 = vpow2.f32 %v243_v11  ;;  %468 = vst [vmem:[%s598_s19 + $0x18] sm:$0xff] %v290_v13 }
  0x1d   : > { %507 = vpow2.f32 %v245_v12 }
  0x29   : > { %v506_v14 = vpop.eup %505 }
  0x2a   : > { %v508_v15 = vpop.eup %507  ;;  %v247_v16 = vadd.f32 1.0, %v506_v14 }
  0x2b   : > { %v248_v17 = vadd.f32 1.0, %v508_v15 }
  0x2c   : > { %509 = vrcp.f32 %v247_v16 }
  0x2d   : > { %511 = vrcp.f32 %v248_v17 }
  0x2e   : > { %513 = vlog2.f32 %v247_v16 }
  0x2f   : > { %515 = vlog2.f32 %v248_v17 }
  0x39   : > { %v510_v22 = vpop.eup %509 }
  0x3a   : > { %v512_v23 = vpop.eup %511  ;;  %v255_v25 = vsub.f32 1.0, %v510_v22 }
  0x3b   : > { %v514_v26 = vpop.eup %513  ;;  %v256_v28 = vsub.f32 1.0, %v512_v23 }
  0x3c   : > { %v516_v29 = vpop.eup %515  ;;  %v266_v30 = vmul.f32 0.6931472, %v514_v26  ;;  %v257_v31 = vsel %vm253_vm0, %v510_v22, %v255_v25 }
  0x3d   : > { %v268_v32 = vmul.f32 0.6931472, %v516_v29  ;;  %v258_v33 = vsel %vm254_vm1, %v512_v23, %v256_v28  ;;  %v271_v34 = vmul.f32 %v257_v31, %v237_v5 }
  0x3e   : > { %v269_v36 = vadd.f32 %v266_v30, %v263_v24  ;;  %v272_v37 = vmul.f32 %v258_v33, %v238_v6  ;;  %v284_v38 = vadd.f32 %v258_v33, %v257_v31 }
  0x3f   : > { %v270_v39 = vadd.f32 %v268_v32, %v264_v27 }
  0x40   : > { %v279_v42 = vadd.f32 %v272_v37, %v271_v34  ;;  %v285_v43 = vadd.f32 %v465_v35, %v284_v38 }
  0x41   : > { %v274_v44 = vadd.f32 %v270_v39, %v269_v36 }
  0x42   : > { %v280_v45 = vadd.f32 %v463_v40, %v279_v42  ;;  %466 = vst [vmem:[%s598_s19 + $0x10] sm:$0xff] %v285_v43 }
  0x43   : > { %v275_v46 = vadd.f32 %v274_v44, %v273_v41 }
  0x44   : > { %464 = vst [vmem:[%s598_s19 + $0x8] sm:$0xff] %v280_v45 }
  0x45   : > { %276 = vst [vmem:[%s598_s19] sm:$0xff] %v275_v46 }
  0x46 PF: > { %295 = sbr.rel (%p217_p5) target bundleno = 125 (0x7d), region = 40  ;;  %s470_s27 = sshll.u32 (!%p217_p5), %s543_s9, 4 }
  0x4b   : > { %v296_v47 = vld [vmem:[%s607_s23] sm:$0xff]  ;;  %v297_v48 = vld [vmem:[%s607_s23 + $0x8] sm:$0xff]  ;;  %v335_v49 = vlaneseq  ;;  %v338_v53 = vstv %s470_s27  ;;  %v475_v6 = vld [vmem:[%s598_s19 + $0x18] sm:$0xff] }
  0x4c   : > { %v300_v50 = vand.u32 2147483647, %v296_v47  ;;  %v301_v51 = vand.u32 2147483647, %v297_v48  ;;  %v298_v1 = vld [vmem:[%s612_s26] sm:$0xff]  ;;  %v299_v4 = vld [vmem:[%s612_s26 + $0x8] sm:$0xff] }
  0x4d   : > { %v336_v52 = vshrl.u32 %v335_v49, 7  ;;  %v342_v58 = vand.u32 127, %v335_v49  ;;  %v320_v13 = vmax.f32 %v296_v47, 0.0  ;;  %v322_v14 = vmul.f32 %v298_v1, %v296_v47  ;;  %v473_v34 = vld [vmem:[%s598_s19 + $0x10] sm:$0xff]  ;;  %v471_v40 = vld [vmem:[%s598_s19 + $0x8] sm:$0xff]  ;;  %v357_v42 = vld [vmem:[%s598_s19] sm:$0xff] }
  0x4e   : > { %v302_v54 = vsub.f32 0.0, %v300_v50  ;;  %v303_v55 = vsub.f32 0.0, %v301_v51  ;;  %v321_v15 = vmax.f32 %v297_v48, 0.0  ;;  %v323_v16 = vmul.f32 %v299_v4, %v297_v48 }
  0x4f   : > { %v337_v56 = vadd.s32 8, %v336_v52  ;;  %v339_v57 = vadd.s32 %v338_v53, %v336_v52  ;;  %vm314_vm4 = vcmp.ge.f32.partialorder %v296_v47, 0.0  ;;  %v324_v19 = vsub.f32 %v320_v13, %v322_v14 }
  0x50   : > { %v304_v59 = vmul.f32 1.442695, %v302_v54  ;;  %v306_v60 = vmul.f32 1.442695, %v303_v55  ;;  %vm315_vm5 = vcmp.ge.f32.partialorder %v297_v48, 0.0  ;;  %v325_v22 = vsub.f32 %v321_v15, %v323_v16 }
  0x51   : > { %v340_v61 = vadd.s32 %v338_v53, %v337_v56  ;;  %v343_v62 = vmul.u32 128, %v339_v57 }
  0x52   : > { %517 = vpow2.f32 %v304_v59 }
  0x53   : > { %519 = vpow2.f32 %v306_v60  ;;  %v344_v63 = vmul.u32 128, %v340_v61  ;;  %v345_v0 = vadd.s32 %v343_v62, %v342_v58 }
  0x55   : > { %v346_v2 = vadd.s32 %v344_v63, %v342_v58  ;;  %vm347_vm2 = vcmp.lt.s32.totalorder %v345_v0, 2048 }
  0x56   : > { %v355_v3 = vsel %vm347_vm2, %v298_v1, 0.0 }
  0x57   : > { %vm348_vm3 = vcmp.lt.s32.totalorder %v346_v2, 2048 }
  0x58   : > { %v356_v5 = vsel %vm348_vm3, %v299_v4, 0.0 }
  0x59   : > { %v373_v7 = vadd.f32 %v356_v5, %v355_v3 }
  0x5b   : > { %v374_v8 = vadd.f32 %v475_v6, %v373_v7 }
  0x5d   : > { %476 = vst [vmem:[%s598_s19 + $0x18] sm:$0xff] %v374_v8 }
  0x5f   : > { %v518_v9 = vpop.eup %517 }
  0x60   : > { %v520_v10 = vpop.eup %519  ;;  %v308_v11 = vadd.f32 1.0, %v518_v9 }
  0x61   : > { %v309_v12 = vadd.f32 1.0, %v520_v10 }
  0x62   : > { %521 = vrcp.f32 %v308_v11 }
  0x63   : > { %523 = vrcp.f32 %v309_v12 }
  0x64   : > { %525 = vlog2.f32 %v308_v11 }
  0x65   : > { %527 = vlog2.f32 %v309_v12 }
  0x6f   : > { %v522_v17 = vpop.eup %521 }
  0x70   : > { %v524_v18 = vpop.eup %523  ;;  %v316_v20 = vsub.f32 1.0, %v522_v17 }
  0x71   : > { %v526_v21 = vpop.eup %525  ;;  %v317_v23 = vsub.f32 1.0, %v524_v18 }
  0x72   : > { %v528_v24 = vpop.eup %527  ;;  %v327_v25 = vmul.f32 0.6931472, %v526_v21  ;;  %v318_v26 = vsel %vm314_vm4, %v522_v17, %v316_v20 }
  0x73   : > { %v329_v27 = vmul.f32 0.6931472, %v528_v24  ;;  %v319_v28 = vsel %vm315_vm5, %v524_v18, %v317_v23  ;;  %v332_v29 = vmul.f32 %v318_v26, %v298_v1  ;;  %v353_v30 = vsel %vm347_vm2, %v318_v26, 0.0 }
  0x74   : > { %v330_v31 = vadd.f32 %v327_v25, %v324_v19  ;;  %v333_v32 = vmul.f32 %v319_v28, %v299_v4  ;;  %v354_v33 = vsel %vm348_vm3, %v319_v28, 0.0 }
  0x75   : > { %v331_v35 = vadd.f32 %v329_v27, %v325_v22  ;;  %v351_v36 = vsel %vm347_vm2, %v332_v29, 0.0  ;;  %v368_v37 = vadd.f32 %v354_v33, %v353_v30 }
  0x76   : > { %v349_v38 = vsel %vm347_vm2, %v330_v31, 0.0  ;;  %v352_v39 = vsel %vm348_vm3, %v333_v32, 0.0 }
  0x77   : > { %v350_v41 = vsel %vm348_vm3, %v331_v35, 0.0  ;;  %v363_v43 = vadd.f32 %v352_v39, %v351_v36  ;;  %v369_v44 = vadd.f32 %v473_v34, %v368_v37 }
  0x78   : > { %v358_v45 = vadd.f32 %v350_v41, %v349_v38 }
  0x79   : > { %v364_v46 = vadd.f32 %v471_v40, %v363_v43  ;;  %474 = vst [vmem:[%s598_s19 + $0x10] sm:$0xff] %v369_v44 }
  0x7a   : > { %v359_v47 = vadd.f32 %v358_v45, %v357_v42 }
  0x7b   : > { %472 = vst [vmem:[%s598_s19 + $0x8] sm:$0xff] %v364_v46 }
  0x7c   : > { %360 = vst [vmem:[%s598_s19] sm:$0xff] %v359_v47 }
  0x7d PF: > { %s12_s11 = sadd.s32 1, %s551_s11   ;;  %s662_s9 = smov %s547_s10 }
  0x7e   : > { %p9_p8 = scmp.ge.s32.totalorder %s12_s11, 4   ;;  %s663_s10 = smov %s665_s12 }
  0x80   :  { %11 = sbr.rel (!%p9_p8) target bundleno = 2 (0x2), region = 79 }

</bundles_post_ra>
